<compile_context>
chip_gen: v7x
topology: tpu7x:2x2x1
jax: 0.10.0
libtpu: 0.0.40
codegen_flags: <defaults>
</compile_context>

<pallas_src>
from functools import partial

import jax
import jax.numpy as jnp
import numpy as np
from jax.experimental import pallas as pl
from jax.experimental.pallas import tpu as pltpu


def _round_up(x: int, m: int) -> int:
    return ((x + m - 1) // m) * m


def _greedy_argmax_kernel(e_ref, idx_ref):
    """Per-timestep argmax over labels; labels on sublanes, time on lanes."""
    e = e_ref[...].astype(jnp.float32)          # (L, T_TILE); cast per-tile (free VPU)
    num_label = e.shape[0]
    # Sublane reduce: per-lane (per-timestep) max over the label axis.
    m = jnp.max(e, axis=0, keepdims=True)       # (1, T_TILE)
    # Label index per sublane (int32 iota -> f32 so the min below is a plain
    # float sublane reduction; values <= num_label are exact in f32).
    lbl = jax.lax.broadcasted_iota(jnp.int32, e.shape, 0).astype(jnp.float32)
    # First-max tie-break (torch.argmax / np.argmax semantics).  NaN frames:
    # torch/np treat NaN as the maximum, so NaN positions are candidates too
    # ((e != e) marks NaNs); hence the sentinel below can never survive.
    is_cand = (e == m) | (e != e)
    cand = jnp.where(is_cand, lbl, jnp.float32(num_label))
    idx = jnp.min(cand, axis=0, keepdims=True)  # (1, T_TILE), first max / first NaN
    # Defensive clamp (unreachable) so the host-side label lookup stays in range.
    idx_ref[...] = jnp.minimum(idx, num_label - 1).astype(jnp.int32)


@partial(jax.jit, static_argnames=("t_tile",))
def _greedy_argmax(emission: jax.Array, t_tile: int) -> jax.Array:
    num_seq, num_label = emission.shape
    if num_seq == 0:
        return jnp.zeros((0,), jnp.int32)

    # [L, T]: labels on sublanes, time on lanes -> lane-dense kernel reads,
    # sublane-reduce argmax, lane-dense int32 writes.
    # TODO(synk): have the producer emit [num_label, num_seq] to drop this pass.
    em_t = jnp.transpose(emission)              # (L, T), producer dtype (f32/bf16)

    # Time tile lives on the lane axis -> multiple of 128.
    # Default 32768 lanes * 32 labels * 4 B = 4 MiB per input buffer
    # (~8 MiB double-buffered + small output buffers): fits the scoped-VMEM
    # defaults on v5e (16 MiB) / v6e (32 MiB) / v7x (32 of 64 MiB physical)
    # while amortizing the ~0.35 us per-grid-step overhead to <10%.
    t = max(128, min(t_tile, _round_up(num_seq, 128)))
    t = _round_up(t, 128)
    if num_seq > 128:
        # Guarantee >= 2 grid steps so the "parallel" axis spans both
        # TensorCores on v7x (harmless no-op on single-TC v5e/v6e).
        t = min(t, max(128, _round_up(-(-num_seq // 2), 128)))
    grid = (pl.cdiv(num_seq, t),)

    out = pl.pallas_call(
        _greedy_argmax_kernel,
        out_shape=jax.ShapeDtypeStruct((1, num_seq), jnp.int32),
        grid=grid,
        in_specs=[pl.BlockSpec((num_label, t), lambda i: (0, i))],
        out_specs=pl.BlockSpec((1, t), lambda i: (0, i)),
        compiler_params=pltpu.CompilerParams(
            dimension_semantics=("parallel",),      # shard time tiles across TCs (v7x)
            vmem_limit_bytes=32 * 1024 * 1024,      # headroom for tile sweeps; safe on all gens
        ),
    )(em_t)
    return out.reshape(-1)


def greedy_argmax(emission: jax.Array, *, t_tile: int = 32768) -> jax.Array:
    """Best-path label indices of shape [num_seq], int32."""
    return _greedy_argmax(emission, t_tile=int(t_tile))


class GreedyCTCDecoder:
    """JAX/Pallas port of the PyTorch GreedyCTCDecoder."""

    def __init__(self, labels, ignore, t_tile: int = 32768):
        self.labels = labels
        self.ignore = np.asarray(sorted(set(int(i) for i in ignore)), dtype=np.int32)
        self.t_tile = t_tile

    def __call__(self, emission: jax.Array) -> str:
        idx_dev = greedy_argmax(emission, t_tile=self.t_tile)   # Pallas argmax hot path
        idx = np.asarray(jax.block_until_ready(idx_dev)).reshape(-1)
        if idx.size == 0:
            return ''
        # unique_consecutive, vectorized (no per-timestep Python loop).
        keep = np.empty(idx.shape, dtype=bool)
        keep[0] = True
        np.not_equal(idx[1:], idx[:-1], out=keep[1:])
        collapsed = idx[keep]
        # drop ignored (blank) symbols.
        if self.ignore.size:
            collapsed = collapsed[~np.isin(collapsed, self.ignore)]
        # TODO(synk): variable-length collapse + string join has no fixed-shape
        # Pallas equivalent; done on host.
        return ''.join(self.labels[int(i)] for i in collapsed)


if __name__ == "__main__":
    # Small shapes, chosen to exercise multi-tile + a partial final tile.
    num_seq, num_label = 300, 32
    labels = "-abcdefghijklmnopqrstuvwxyz .,'?"     # index 0 is the CTC blank
    assert len(labels) == num_label
    decoder = GreedyCTCDecoder(labels, ignore=(0,))  # default tiling (clamps to 2 tiles here)

    key = jax.random.PRNGKey(0)
    emission = jax.random.normal(key, (num_seq, num_label), dtype=jnp.float32)

    # Kernel-level check against plain numpy argmax: small tile (grid=(3,), partial last tile).
    idx = np.asarray(jax.block_until_ready(greedy_argmax(emission, t_tile=128)))
    ref_idx = np.argmax(np.asarray(emission), axis=-1)
    assert idx.shape == (num_seq,)
    assert np.array_equal(idx, ref_idx), (idx[:16], ref_idx[:16])

    # Default-tile path (clamped so the grid still has >= 2 steps).
    idx2 = np.asarray(jax.block_until_ready(greedy_argmax(emission)))
    assert np.array_equal(idx2, ref_idx)

    # End-to-end transcript check against a numpy reference greedy decode.
    transcript = decoder(emission)
    keep = np.concatenate([[True], ref_idx[1:] != ref_idx[:-1]])
    ref_collapsed = ref_idx[keep]
    ref_transcript = ''.join(labels[i] for i in ref_collapsed if i != 0)
    assert transcript == ref_transcript, (transcript, ref_transcript)

    print("KERNEL_OK")
</pallas_src>

<mosaic_0001>
module attributes {stable_mosaic.version = 11 : i64} {
  func.func @_greedy_argmax_kernel(%arg0: i32, %arg1: memref<32x128xf32, #tpu.memory_space<vmem>>, %arg2: memref<1x128xi32, #tpu.memory_space<vmem>>) attributes {dimension_semantics = [#tpu.dimension_semantics<parallel>], iteration_bounds = array<i64: 3>, scalar_prefetch = 0 : i64, scratch_operands = 0 : i64, tpu.core_type = #tpu.core_type<tc>, window_params = [{transform_indices = @transform_0, window_bounds = array<i64: 32, 128>}, {transform_indices = @transform_1, window_bounds = array<i64: 1, 128>}]} {
    %c0 = arith.constant 0 : index
    %c0_0 = arith.constant 0 : index
    %0 = vector.load %arg1[%c0, %c0_0] : memref<32x128xf32, #tpu.memory_space<vmem>>, vector<32x128xf32>
    %cst = arith.constant dense<0xFF800000> : vector<128xf32>
    %1 = vector.multi_reduction <maximumf>, %0, %cst [0] : vector<32x128xf32> to vector<128xf32>
    %2 = vector.shape_cast %1 : vector<128xf32> to vector<1x128xf32>
    %3 = tpu.iota {dimensions = array<i32: 0>} : vector<32x128xi32>
    %4 = arith.sitofp %3 : vector<32x128xi32> to vector<32x128xf32>
    %5 = vector.broadcast %2 : vector<1x128xf32> to vector<32x128xf32>
    %6 = arith.cmpf oeq, %0, %5 : vector<32x128xf32>
    %7 = arith.cmpf one, %0, %0 : vector<32x128xf32>
    %8 = arith.ori %6, %7 : vector<32x128xi1>
    %cst_1 = arith.constant 3.200000e+01 : f32
    %9 = vector.broadcast %cst_1 : f32 to vector<32x128xf32>
    %10 = arith.select %8, %4, %9 : vector<32x128xi1>, vector<32x128xf32>
    %cst_2 = arith.constant dense<0x7F800000> : vector<128xf32>
    %11 = vector.multi_reduction <minimumf>, %10, %cst_2 [0] : vector<32x128xf32> to vector<128xf32>
    %12 = vector.shape_cast %11 : vector<128xf32> to vector<1x128xf32>
    %cst_3 = arith.constant 3.100000e+01 : f32
    %13 = vector.broadcast %cst_3 : f32 to vector<1x128xf32>
    %14 = arith.minimumf %12, %13 : vector<1x128xf32>
    %15 = arith.fptosi %14 : vector<1x128xf32> to vector<1x128xi32>
    %c0_4 = arith.constant 0 : index
    %c0_5 = arith.constant 0 : index
    %16 = vector.load %arg2[%c0_4, %c0_5] : memref<1x128xi32, #tpu.memory_space<vmem>>, vector<1x128xi32>
    tpu.vector_store %arg2[%c0_4, %c0_5], %15 {strides = array<i32>} : memref<1x128xi32, #tpu.memory_space<vmem>>, vector<1x128xi32>,
    return
  }
  func.func @transform_0(%arg0: i32) -> (i32, i32) {
    %c0_i32 = arith.constant 0 : i32
    %c0_i32_0 = arith.constant 0 : i32
    return %c0_i32, %arg0 : i32, i32
  }
  func.func @transform_1(%arg0: i32) -> (i32, i32) {
    %c0_i32 = arith.constant 0 : i32
    %c0_i32_0 = arith.constant 0 : i32
    return %c0_i32, %arg0 : i32, i32
  }
}

</mosaic_0001>

<bundles_post_ra>
// kernel: _greedy_argmax.1
= control target key start
LH: loop header
LB: loop body
LE: loop exit
PB: predicated region body
PF: predicated region fallthrough
CT: control target
= control target key end

     0   :  { %6 = vsyncpa [#allocation3], 0  ;;  %s480_s0 = inlined_call_operand.hbm [shape: f32[32,300], index: 0, kind: input, shape index: {}]   ;;  %s481_s1 = inlined_call_operand.vmem [shape: s32[1,300], index: 1, kind: output, shape index: {}]  }
   0x1   :  { %8 = vsyncpa [#allocation3 + $0x1], 0  ;;  %s374_s6 = smov 0   ;;  %s376_s7 = smov 0  }
   0x2   :  { %s378_s8 = smov 0   ;;  %s380_s9 = smov 0  }
   0x3 LB: > { %s393_s10 = sadd.s32 4294967295, %s358_s9   ;;  %s396_s11 = sadd.s32 1, %s358_s9   ;;  %s358_s9 = sphi %s380_s9, %s487_s9   ;;  %s354_s8 = sphi %s378_s8, %s486_s8   ;;  %s350_s7 = sphi %s376_s7, %s485_s7   ;;  %s346_s6 = sphi %s374_s6, %s484_s6  }
   0x4   : > { %s18_s12 = ssub.s32 %s358_s9, %s396_s11  ;;  %s21_s13 = sadd.s32 1, %s354_s8 }
   0x5   : > { %p19_p0 = scmp.eq.s32.totalorder %s18_s12, 0  ;;  %p28_p1 = scmp.ne.s32.totalorder %s354_s8, %s350_s7 }
   0x6   : > { %p29_p2 = scmp.eq.s32.totalorder %s358_s9, 0  ;;  %p34_p3 = scmp.ne.s32.totalorder %s350_s7, %s346_s6 }
   0x7   : > { %s406_s14 = scalar_select %p19_p0, %s354_s8, %s21_s13  }
   0x8   : > { %p30_p4 = por %p29_p2, %p28_p1  ;;  %p35_p5 = scmp.eq.s32.totalorder %s393_s10, 0 }
   0x9   : > { %p258_p6 = scmp.lt.s32.totalorder %s358_s9, 3  ;;  %s84_s16 = sand.u32 1, %s354_s8  }
   0xa   : > { %p410_p7 = por %p35_p5, %p34_p3  ;;  %s244_s17 = sshll.u32 %s84_s16, 5 }
   0xb   : > { %s245_s18 = sshll.u32 %s358_s9, 7  ;;  %s88_s22 = scalar_lea.vmem [#allocation2], %s244_s17 }
   0xc   : > { %s419_s21 = scalar_lea.hbm %s480_s0, %s245_s18  ;;  %s94_s23 = sshll.u32 %s88_s22, 4  ;;  %s421_s23 = int_to_ptr.vmem [resolvable:$true] %s94_s23 }
   0xd   : > { %p423_p8 = pnand %p258_p6, %p30_p4  ;;  %s427_s25 = scalar_lea.sflag [#allocation3], %s84_s16 }
   0xe   : > { %s294_s26 = scalar_lea.hbm %s419_s21, 512  ;;  %s299_s29 = scalar_lea.hbm %s480_s0, 1536 }
   0xf   : > { %p295_p9 = scmp.ne.s32.totalorder %s419_s21, %s294_s26  ;;  %p296_p10 = pneg %p423_p8 }
  0x10   : > { %p300_p13 = scmp.lt.u32.totalorder %s419_s21, %s480_s0  ;;  %p301_p0 = scmp.lt.u32.totalorder %s299_s29, %s294_s26 }
  0x11   : > { %p297_p11 = pnand %p296_p10, %p295_p9  ;;  %p303_p2 = scmp.lt.u32.totalorder %s294_s26, %s419_s21 }
  0x12   : > { %p302_p1 = por %p301_p0, %p300_p13 }
  0x13   : > { %p298_p12 = pneg %p297_p11 }
  0x14   : > { %p304_p3 = por %p303_p2, %p302_p1 }
  0x16   : > { %p305_p4 = pnand %p304_p3, %p298_p12 }
  0x18   : > { %308 = shalt.err (!%p305_p4)
}
  0x19   : > { %s309_s3 = scalar_lea.vmem %s421_s23, 512  ;;  %s360_s4 = smov [#allocation2]  }
  0x1a   : > { %p310_p5 = scmp.ne.s32.totalorder %s421_s23, %s309_s3  ;;  %s314_s5 = sshll.u32 %s360_s4, 4  ;;  %s315_s5 = int_to_ptr.vmem [resolvable:$false] %s314_s5 }
  0x1b   : > { %s316_s6 = scalar_lea.vmem %s315_s5, 1024  ;;  %p317_p11 = scmp.lt.s32.totalorder %s421_s23, %s315_s5 }
  0x1c   : > { %p312_p6 = pnand %p310_p5, %p296_p10  ;;  %p318_p13 = scmp.lt.s32.totalorder %s316_s6, %s309_s3 }
  0x1e   : > { %p313_p9 = pneg %p312_p6  ;;  %p319_p0 = por %p318_p13, %p317_p11 }
  0x20   : > { %p320_p1 = pnand %p319_p0, %p313_p9 }
  0x22   : > { %323 = shalt.err (!%p320_p1)
}
  0x23   : > { %s361_s12 = smov 384   ;;  %s362_s13 = smov 128  }
  0x24   : > { %s363_s16 = smov 8   ;;  %p246_p10 = scmp.ge.s32.totalorder %s358_s9, 1 }
  0x25   : > { %257 = dma.hbm_to_vmem [thread:$0]  (!%p423_p8), %s419_s21, 512, %s421_s23, %s427_s25, %s361_s12, %s362_s13, %s363_s16  }
  0x26   : > { %p102_p12 = scmp.lt.s32.totalorder %s358_s9, 4 }
  0x28   : > { %p103_p2 = pnand %p246_p10, %p102_p12 }
  0x29   : > { %s108_s17 = sand.u32 (!%p103_p2), 1, %s350_s7  }
  0x2a   : > { %106 = sbr.rel (%p103_p2) target bundleno = 97 (0x61), region = 24  ;;  %s247_s18 = sshll.u32 (!%p103_p2), %s108_s17, 5 }
  0x2b   : > { %s109_s19 = scalar_lea.sflag (!%p103_p2), [#allocation3], %s108_s17  ;;  %s112_s20 = scalar_lea.vmem (!%p103_p2), [#allocation2], %s247_s18 }
  0x31   : > { %341 = dma.done.wait (%p410_p7), %s109_s19, 512  }
  0x32   : > { %343 = vsyncadd (%p410_p7), %s109_s19, 4294966784  ;;  %v132_v0 = vld [vmem:[%s112_s20] sm:$0xff]  ;;  %v133_v1 = vld [vmem:[%s112_s20 + $0x8] sm:$0xff]  ;;  %v145_v7 = vlaneseq  ;;  %p129_p7 = scmp.lt.s32.totalorder %s393_s10, 2 }
  0x33   : > { %v134_v2 = vld [vmem:[%s112_s20 + $0x10] sm:$0xff]  ;;  %v135_v3 = vld [vmem:[%s112_s20 + $0x18] sm:$0xff]  ;;  %v136_v4 = vmax.f32 %v132_v0, %v133_v1  ;;  %vm158_vm0 = vcmp.ne.f32.partialorder %v132_v0, %v132_v0  ;;  %vm159_vm1 = vcmp.ne.f32.partialorder %v133_v1, %v133_v1 }
  0x34   : > { %v137_v5 = vmax.f32 %v134_v2, %v135_v3  ;;  %v146_v10 = vshrl.u32 %v145_v7, 7  ;;  %vm160_vm5 = vcmp.ne.f32.partialorder %v134_v2, %v134_v2  ;;  %vm161_vm7 = vcmp.ne.f32.partialorder %v135_v3, %v135_v3  ;;  %s489_s10 = smov (!%p129_p7, %s393_s10), 2 }
  0x35   : > { %s131_s21 = scalar_lea.vmem %s481_s1, %s489_s10 }
  0x36   : > { %v138_v6 = vmax.f32 %v136_v4, %v137_v5  ;;  %v147_v13 = vadd.s32 8, %v146_v10  ;;  %v148_v14 = vadd.s32 16, %v146_v10  ;;  %v149_v16 = vadd.s32 24, %v146_v10 }
  0x37   : > { %v150_v18 = vcvt.s32.f32 %v146_v10 }
  0x38   : > { %v139_v8 = vrot.slane %v138_v6, 4  ;;  %v151_v19 = vcvt.s32.f32 %v147_v13  ;;  %v152_v20 = vcvt.s32.f32 %v148_v14  ;;  %v153_v21 = vcvt.s32.f32 %v149_v16 }
  0x3a   : > { %v140_v9 = vmax.f32 %v138_v6, %v139_v8 }
  0x3c   : > { %v141_v11 = vrot.slane %v140_v9, 2 }
  0x3e   : > { %v142_v12 = vmax.f32 %v140_v9, %v141_v11 }
  0x40   : > { %v143_v15 = vrot.slane %v142_v12, 1 }
  0x42   : > { %v144_v17 = vmax.f32 %v142_v12, %v143_v15 }
  0x44   : > { %vm154_vm2 = vcmp.eq.f32.partialorder %v132_v0, %v144_v17  ;;  %vm155_vm3 = vcmp.eq.f32.partialorder %v133_v1, %v144_v17  ;;  %vm156_vm4 = vcmp.eq.f32.partialorder %v134_v2, %v144_v17  ;;  %vm157_vm6 = vcmp.eq.f32.partialorder %v135_v3, %v144_v17 }
  0x45   : > { %vm162_vm8 = vmor %vm154_vm2, %vm158_vm0 }
  0x46   : > { %vm163_vm9 = vmor %vm155_vm3, %vm159_vm1  ;;  %v166_v22 = vsel %vm162_vm8, %v150_v18, 32.0 }
  0x47   : > { %vm164_vm10 = vmor %vm156_vm4, %vm160_vm5  ;;  %v167_v23 = vsel %vm163_vm9, %v151_v19, 32.0 }
  0x48   : > { %vm165_vm11 = vmor %vm157_vm6, %vm161_vm7  ;;  %v168_v24 = vsel %vm164_vm10, %v152_v20, 32.0  ;;  %v170_v25 = vmin.f32 %v166_v22, %v167_v23 }
  0x49   : > { %v169_v26 = vsel %vm165_vm11, %v153_v21, 32.0 }
  0x4a   : > { %v171_v27 = vmin.f32 %v168_v24, %v169_v26 }
  0x4c   : > { %v172_v28 = vmin.f32 %v170_v25, %v171_v27 }
  0x4e   : > { %v173_v29 = vrot.slane %v172_v28, 4 }
  0x50   : > { %v174_v30 = vmin.f32 %v172_v28, %v173_v29 }
  0x52   : > { %v175_v31 = vrot.slane %v174_v30, 2 }
  0x54   : > { %v176_v32 = vmin.f32 %v174_v30, %v175_v31 }
  0x56   : > { %v177_v33 = vrot.slane %v176_v32, 1 }
  0x58   : > { %v178_v34 = vmin.f32 %v176_v32, %v177_v33 }
  0x5a   : > { %v179_v35 = vmin.f32 %v178_v34, 31.0 }
  0x5c   : > { %v250_v36 = vtrunc.f32 %v179_v35 }
  0x5e   : > { %v251_v37 = vcvt.f32.s32 %v250_v36 }
  0x60   : > { %181 = vst [vmem:[%s131_s21] sm:$0x1] %v251_v37 }
  0x61 PF: > { %p11_p8 = scmp.ge.s32.totalorder %s396_s11, 5   ;;  %s484_s6 = smov %s350_s7 }
  0x62   : > { %s485_s7 = smov %s354_s8  ;;  %s486_s8 = smov %s406_s14 }
  0x63   : > { %s487_s9 = smov %s396_s11  ;;  %13 = sbr.rel (!%p11_p8) target bundleno = 3 (0x3), region = 64 }
  0x6a   :  { %199 = vsyncpa [#allocation3], 1 }
  0x6b   :  { %201 = vsyncpa [#allocation3 + $0x1], 1 }

</bundles_post_ra>
